<compile_context>
chip_gen: v7x
topology: tpu7x:2x2x1
jax: 0.10.0
libtpu: 0.0.40
codegen_flags: <defaults>
</compile_context>

<pallas_src>
import math
from functools import partial

import jax
import jax.numpy as jnp
from jax.experimental import pallas as pl
from jax.experimental.pallas import tpu as pltpu

LANE = 128          # feature dims padded to multiples of this
SUBLANE_BF16 = 16   # bf16 sublane packing: batch tiles aligned to this


def _round_up(x, m):
    return ((x + m - 1) // m) * m


def _cdiv(a, b):
    return -(-a // b)


def _apply_activation(y, name):
    if name is None:
        return y
    if name == "relu":
        return jnp.maximum(y, 0.0)
    if name == "sigmoid":
        return jax.nn.sigmoid(y)
    if name == "tanh":
        return jnp.tanh(y)
    raise ValueError(f"unknown activation {name!r}")


def _tpu_env():
    """Returns (vmem_budget_bytes, n_tensorcores, max_tile_b)."""
    vmem_cap = 64 * 1024 * 1024  # conservative default (v7x per-TC VMEM)
    try:
        vmem_cap = int(pltpu.get_tpu_info().vmem_capacity_bytes)
    except Exception:
        pass
    # Leave headroom for compiler-internal scratch / pipeline bookkeeping:
    # ~8 MiB on v7x (64 MiB/TC), ~16 MiB on v5e/v6e (128 MiB).
    budget = vmem_cap - max(8 * 1024 * 1024, vmem_cap // 8)
    n_cores = 1
    try:
        kind = (jax.devices()[0].device_kind or "").lower()
        if "v7" in kind:
            n_cores = 2          # v7x: 2 TensorCores/chip can split the grid
    except Exception:
        pass
    max_tile_b = 512 if vmem_cap <= 64 * 1024 * 1024 else 1024
    return budget, n_cores, max_tile_b


def _const_block_spec(shape, single_buffer):
    """BlockSpec for an array that is identical for every grid step."""
    index_map = lambda i: (0,) * len(shape)
    if single_buffer:
        # Constant index_map -> never re-fetched; single-buffering halves its
        # resident VMEM footprint vs the default double buffer.
        return pl.BlockSpec(shape, index_map, pipeline_mode=pl.Buffered(1))
    return pl.BlockSpec(shape, index_map)


def _pick_feature_tile(dim, cap):
    """Largest multiple of LANE <= cap that divides dim (dim is LANE-aligned)."""
    best = LANE
    t = LANE
    while t <= min(dim, cap):
        if dim % t == 0:
            best = t
        t += LANE
    return best


# --------------------------------------------------------------------------
# Fused kernel: full encoder + decoder stack for one batch tile.
#   refs = (w0, b0, w1, b1, ..., w_{L-1}, b_{L-1}, latent_ref, recon_ref)
# Weights bf16 (f_in_pad, f_out_pad); biases f32 (1, f_out_pad).
# Activations are carried in bf16 between layers; matmul accumulate, bias-add
# and activation run in f32.
# --------------------------------------------------------------------------
def _fused_mlp_kernel(x_ref, *refs, n_layers, latent_idx, activations):
    latent_ref = refs[2 * n_layers]
    recon_ref = refs[2 * n_layers + 1]

    h = x_ref[...]                                  # (TILE_B, in_pad) bf16
    for li in range(n_layers):                      # statically unrolled
        w_ref = refs[2 * li]
        b_ref = refs[2 * li + 1]
        # bf16 x bf16 -> f32 accumulate on the MXU
        y = jnp.dot(h, w_ref[...], preferred_element_type=jnp.float32)
        y = y + b_ref[...]                          # (1, f_out) f32 broadcast
        y = _apply_activation(y, activations[li])
        h = y.astype(jnp.bfloat16)                  # bf16 carry: halves live VMEM
        if li == latent_idx:
            latent_ref[...] = h
    recon_ref[...] = h


# --------------------------------------------------------------------------
# Fallback kernel: single Linear(+activation) as a tiled (M, N, K) matmul.
# Used only when the resident-weight footprint exceeds the VMEM budget.
# --------------------------------------------------------------------------
def _linear_act_kernel(x_ref, w_ref, b_ref, o_ref, acc_ref, *, activation):
    @pl.when(pl.program_id(2) == 0)
    def _():
        acc_ref[...] = jnp.zeros_like(acc_ref)

    acc_ref[...] += jnp.dot(x_ref[...], w_ref[...],
                            preferred_element_type=jnp.float32)

    @pl.when(pl.program_id(2) == pl.num_programs(2) - 1)
    def _():
        y = acc_ref[...] + b_ref[...]
        y = _apply_activation(y, activation)
        o_ref[...] = y.astype(o_ref.dtype)


# --------------------------------------------------------------------------
# Parameter initialization (mirrors nn.Linear's uniform(+-1/sqrt(fan_in))).
# Weights stored already transposed to (f_in, f_out); kernel copies are
# zero-padded to (f_in_pad, f_out_pad) and cast to bf16.
# --------------------------------------------------------------------------
def _init_linear(key, f_in, f_out):
    kw, kb = jax.random.split(key)
    bound = 1.0 / math.sqrt(f_in)
    w = jax.random.uniform(kw, (f_in, f_out), jnp.float32, -bound, bound)
    b = jax.random.uniform(kb, (f_out,), jnp.float32, -bound, bound)
    return w, b


def _pad_params(w, b):
    f_in, f_out = w.shape
    f_in_p, f_out_p = _round_up(f_in, LANE), _round_up(f_out, LANE)
    w_pad = jnp.zeros((f_in_p, f_out_p), jnp.bfloat16)
    w_pad = w_pad.at[:f_in, :f_out].set(w.astype(jnp.bfloat16))
    b_pad = jnp.zeros((1, f_out_p), jnp.float32).at[0, :f_out].set(b)
    return w_pad, b_pad


class DenseAutoEncoderPallas:
    """JAX/Pallas port of DenseAutoEncoder.

    forward(x) -> (latent, reconstruction), x of shape (B, in_size).
    Outputs are returned in bf16 (halves HBM writeback of the mem-bound
    batch sweep); cast to f32 in the consumer if needed.
    """

    def __init__(self, in_size, enc_sizes, dec_sizes,
                 encoder_activation=None, decoder_activation=None,
                 final_activation=None, bias=True, key=None):
        assert bias, "only bias=True is implemented (matches default)"
        if key is None:
            key = jax.random.PRNGKey(0)

        self.in_size = in_size
        self.latent_size = enc_sizes[-1]
        enc_dims = [in_size, *enc_sizes]
        dec_dims = [enc_sizes[-1], *dec_sizes]

        # per-layer (f_in, f_out) and activation, encoder -> decoder -> last
        self.layer_dims = (
            list(zip(enc_dims, enc_dims[1:]))
            + list(zip(dec_dims, dec_dims[1:]))
            + [(dec_dims[-1], in_size)]
        )
        self.activations = tuple(
            [encoder_activation] * (len(enc_dims) - 1)
            + [decoder_activation] * (len(dec_dims) - 1)
            + [final_activation]
        )
        self.latent_idx = len(enc_dims) - 2   # index of last encoder layer
        self.n_layers = len(self.layer_dims)

        self.params_f32 = []   # (w (f_in,f_out) f32, b (f_out,) f32) reference
        self.params_pad = []   # (w_pad bf16, b_pad f32) for the kernels
        for f_in, f_out in self.layer_dims:
            key, sub = jax.random.split(key)
            w, b = _init_linear(sub, f_in, f_out)
            self.params_f32.append((w, b))
            self.params_pad.append(_pad_params(w, b))

        self.in_pad = _round_up(in_size, LANE)
        self.latent_pad = _round_up(self.latent_size, LANE)
        self.max_pad = max(max(wp.shape) for (wp, _) in self.params_pad)
        # single-buffered resident footprint of all weights + biases
        self.weight_bytes = sum(
            wp.size * wp.dtype.itemsize + bp.size * bp.dtype.itemsize
            for (wp, bp) in self.params_pad)

    # ------------------------------------------------------------------ #
    def _pick_tile_b(self, B, n_cores, budget, max_tile_b):
        # VMEM bytes per batch row held live:
        #   double-buffered bf16 I/O tiles (input + latent + recon)
        #   + two live activation slabs of width max_pad (f32 y + bf16 carry)
        per_row = (2 * 2 * (2 * self.in_pad + self.latent_pad)
                   + 2 * self.max_pad * (4 + 2))
        avail = max(budget - self.weight_bytes, 8 * 1024 * 1024)
        cap = int(avail // max(per_row, 1))
        cap = max(SUBLANE_BF16, min(cap, max_tile_b))
        if cap >= 256:
            cap = (cap // 256) * 256   # full MXU M-occupancy (also 128-aligned)
        else:
            cap = (cap // SUBLANE_BF16) * SUBLANE_BF16

        b_aligned = _round_up(max(B, 1), SUBLANE_BF16)
        tile_b = min(b_aligned, cap)
        if n_cores > 1 and b_aligned >= 2 * SUBLANE_BF16:
            # v7x megacore: make >= 2 batch tiles so both TensorCores get work
            half = _round_up(_cdiv(b_aligned, 2), SUBLANE_BF16)
            tile_b = min(tile_b, half)
        tile_b = max(SUBLANE_BF16, (tile_b // SUBLANE_BF16) * SUBLANE_BF16)
        return tile_b

    # ------------------------------------------------------------------ #
    def _fused_call(self, xb, tile_b, n_tiles, vmem_limit, single_buffer):
        b_pad = xb.shape[0]
        in_specs = [pl.BlockSpec((tile_b, self.in_pad), lambda i: (i, 0))]
        flat_params = []
        for (w_pad, b_arr) in self.params_pad:
            f_in_p, f_out_p = w_pad.shape
            in_specs.append(_const_block_spec((f_in_p, f_out_p), single_buffer))
            in_specs.append(_const_block_spec((1, f_out_p), single_buffer))
            flat_params.extend([w_pad, b_arr])

        out_specs = [
            pl.BlockSpec((tile_b, self.latent_pad), lambda i: (i, 0)),
            pl.BlockSpec((tile_b, self.in_pad), lambda i: (i, 0)),
        ]
        out_shape = [
            jax.ShapeDtypeStruct((b_pad, self.latent_pad), jnp.bfloat16),
            jax.ShapeDtypeStruct((b_pad, self.in_pad), jnp.bfloat16),
        ]
        kernel = partial(_fused_mlp_kernel,
                         n_layers=self.n_layers,
                         latent_idx=self.latent_idx,
                         activations=self.activations)
        return pl.pallas_call(
            kernel,
            out_shape=out_shape,
            grid=(n_tiles,),
            in_specs=in_specs,
            out_specs=out_specs,
            compiler_params=pltpu.CompilerParams(
                dimension_semantics=("parallel",),   # batch tiles independent
                vmem_limit_bytes=int(vmem_limit),
            ),
        )(xb, *flat_params)

    # ------------------------------------------------------------------ #
    def _fallback_forward(self, xb, tile_b, budget):
        """Per-layer tiled matmul path for models whose weights don't fit VMEM."""
        # TODO(synk): could hide per-layer weight DMAs with pltpu.emit_pipeline
        # over HBM-resident weights instead of one pallas_call per layer.
        vmem_limit = int(min(budget, 64 * 1024 * 1024))
        h = xb
        latent = None
        for li, (w_pad, b_arr) in enumerate(self.params_pad):
            f_in_p, f_out_p = w_pad.shape
            tm = tile_b
            tk = _pick_feature_tile(f_in_p, 512)
            tn = _pick_feature_tile(f_out_p, 512)
            grid = (h.shape[0] // tm, f_out_p // tn, f_in_p // tk)
            h_next = pl.pallas_call(
                partial(_linear_act_kernel, activation=self.activations[li]),
                out_shape=jax.ShapeDtypeStruct((h.shape[0], f_out_p),
                                               jnp.bfloat16),
                grid=grid,
                in_specs=[
                    pl.BlockSpec((tm, tk), lambda i, j, k: (i, k)),
                    pl.BlockSpec((tk, tn), lambda i, j, k: (k, j)),
                    pl.BlockSpec((1, tn), lambda i, j, k: (0, j)),
                ],
                out_specs=pl.BlockSpec((tm, tn), lambda i, j, k: (i, j)),
                scratch_shapes=[pltpu.VMEM((tm, tn), jnp.float32)],
                compiler_params=pltpu.CompilerParams(
                    dimension_semantics=("parallel", "parallel", "arbitrary"),
                    vmem_limit_bytes=vmem_limit,
                ),
            )(h, w_pad, b_arr)
            if li == self.latent_idx:
                latent = h_next
            h = h_next
        return latent, h

    # ------------------------------------------------------------------ #
    def __call__(self, x, force_fallback=False):
        B, in_size = x.shape
        assert in_size == self.in_size

        budget, n_cores, max_tile_b = _tpu_env()
        tile_b = self._pick_tile_b(B, n_cores, budget, max_tile_b)
        b_pad = _round_up(B, tile_b)
        n_tiles = b_pad // tile_b

        # bf16 input; pad only when shapes are not already aligned (the pad is
        # a full extra HBM round-trip of the input, skip it when possible).
        xb = x.astype(jnp.bfloat16)
        if b_pad != B or self.in_pad != in_size:
            xb = jnp.pad(xb, ((0, b_pad - B), (0, self.in_pad - in_size)))

        io_bytes = 2 * tile_b * (2 * self.in_pad + self.latent_pad) * 2
        act_bytes = 2 * tile_b * self.max_pad * (4 + 2)
        resident_est = self.weight_bytes + io_bytes + act_bytes

        if force_fallback or resident_est > budget:
            latent_p, recon_p = self._fallback_forward(xb, tile_b, budget)
        else:
            # conservative limit: allow for double-buffered weights in case the
            # single-buffer request is rejected, clamped to the per-chip budget
            vmem_limit = min(budget,
                             max(2 * resident_est + self.weight_bytes,
                                 32 * 1024 * 1024))
            try:
                latent_p, recon_p = self._fused_call(
                    xb, tile_b, n_tiles, vmem_limit, single_buffer=True)
            except Exception:
                # older JAX without Buffered(1) support -> default buffering
                latent_p, recon_p = self._fused_call(
                    xb, tile_b, n_tiles, vmem_limit, single_buffer=False)

        # slice off padding only when there is any (extra HBM traffic otherwise)
        latent = latent_p
        if b_pad != B or self.latent_pad != self.latent_size:
            latent = latent_p[:B, :self.latent_size]
        recon = recon_p
        if b_pad != B or self.in_pad != in_size:
            recon = recon_p[:B, :in_size]
        return latent, recon


# --------------------------------------------------------------------------
# Pure-JAX reference with the same precision policy (bf16 weights/activations,
# f32 accumulate) for checking.
# --------------------------------------------------------------------------
def _ref_forward(model, x):
    h = x.astype(jnp.bfloat16)
    latent = None
    for li, (w, b) in enumerate(model.params_f32):
        y = jnp.dot(h, w.astype(jnp.bfloat16),
                    preferred_element_type=jnp.float32) + b
        y = _apply_activation(y, model.activations[li])
        h = y.astype(jnp.bfloat16)
        if li == model.latent_idx:
            latent = h
    return latent.astype(jnp.float32), h.astype(jnp.float32)


if __name__ == "__main__":
    key = jax.random.PRNGKey(0)
    k_x, k_p = jax.random.split(key)

    # Small shapes consistent with the module's forward: x is (B, in_size).
    B, in_size = 8, 32
    enc_sizes = [64, 16]   # latent dim = 16
    dec_sizes = [64]

    x = jax.random.normal(k_x, (B, in_size), jnp.float32)

    model = DenseAutoEncoderPallas(
        in_size, enc_sizes, dec_sizes,
        encoder_activation="relu",
        decoder_activation="relu",
        final_activation="sigmoid",
        bias=True,
        key=k_p,
    )

    latent, recon = model(x)
    latent = jax.block_until_ready(latent)
    recon = jax.block_until_ready(recon)

    latent_ref, recon_ref = _ref_forward(model, x)
    assert latent.shape == (B, enc_sizes[-1])
    assert recon.shape == (B, in_size)
    assert jnp.allclose(latent.astype(jnp.float32), latent_ref,
                        atol=3e-2, rtol=3e-2)
    assert jnp.allclose(recon.astype(jnp.float32), recon_ref,
                        atol=3e-2, rtol=3e-2)

    # Also exercise the tiled fallback path (used when weights exceed VMEM).
    latent_fb, recon_fb = model(x, force_fallback=True)
    latent_fb = jax.block_until_ready(latent_fb)
    recon_fb = jax.block_until_ready(recon_fb)
    assert jnp.allclose(latent_fb.astype(jnp.float32), latent_ref,
                        atol=3e-2, rtol=3e-2)
    assert jnp.allclose(recon_fb.astype(jnp.float32), recon_ref,
                        atol=3e-2, rtol=3e-2)

    print("KERNEL_OK")
</pallas_src>

<mosaic_0001>
module attributes {stable_mosaic.version = 11 : i64} {
  func.func @_fused_mlp_kernel(%arg0: i32, %arg1: memref<16x128xbf16, #tpu.memory_space<vmem>>, %arg2: memref<128x128xbf16, #tpu.memory_space<vmem>>, %arg3: memref<1x128xf32, #tpu.memory_space<vmem>>, %arg4: memref<128x128xbf16, #tpu.memory_space<vmem>>, %arg5: memref<1x128xf32, #tpu.memory_space<vmem>>, %arg6: memref<128x128xbf16, #tpu.memory_space<vmem>>, %arg7: memref<1x128xf32, #tpu.memory_space<vmem>>, %arg8: memref<128x128xbf16, #tpu.memory_space<vmem>>, %arg9: memref<1x128xf32, #tpu.memory_space<vmem>>, %arg10: memref<16x128xbf16, #tpu.memory_space<vmem>>, %arg11: memref<16x128xbf16, #tpu.memory_space<vmem>>) attributes {dimension_semantics = [#tpu.dimension_semantics<parallel>], iteration_bounds = array<i64: 1>, scalar_prefetch = 0 : i64, scratch_operands = 0 : i64, tpu.core_type = #tpu.core_type<tc>, window_params = [{transform_indices = @transform_0, window_bounds = array<i64: 16, 128>}, {pipeline_mode = #tpu.pipeline_mode<synchronous>, transform_indices = @transform_1, window_bounds = array<i64: 128, 128>}, {pipeline_mode = #tpu.pipeline_mode<synchronous>, transform_indices = @transform_2, window_bounds = array<i64: 1, 128>}, {pipeline_mode = #tpu.pipeline_mode<synchronous>, transform_indices = @transform_3, window_bounds = array<i64: 128, 128>}, {pipeline_mode = #tpu.pipeline_mode<synchronous>, transform_indices = @transform_4, window_bounds = array<i64: 1, 128>}, {pipeline_mode = #tpu.pipeline_mode<synchronous>, transform_indices = @transform_5, window_bounds = array<i64: 128, 128>}, {pipeline_mode = #tpu.pipeline_mode<synchronous>, transform_indices = @transform_6, window_bounds = array<i64: 1, 128>}, {pipeline_mode = #tpu.pipeline_mode<synchronous>, transform_indices = @transform_7, window_bounds = array<i64: 128, 128>}, {pipeline_mode = #tpu.pipeline_mode<synchronous>, transform_indices = @transform_8, window_bounds = array<i64: 1, 128>}, {transform_indices = @transform_9, window_bounds = array<i64: 16, 128>}, {transform_indices = @transform_10, window_bounds = array<i64: 16, 128>}]} {
    %c0 = arith.constant 0 : index
    %c0_0 = arith.constant 0 : index
    %0 = vector.load %arg1[%c0, %c0_0] : memref<16x128xbf16, #tpu.memory_space<vmem>>, vector<16x128xbf16>
    %c0_1 = arith.constant 0 : index
    %c0_2 = arith.constant 0 : index
    %1 = vector.load %arg2[%c0_1, %c0_2] : memref<128x128xbf16, #tpu.memory_space<vmem>>, vector<128x128xbf16>
    %cst = arith.constant dense<0.000000e+00> : vector<16x128xf32>
    %2 = tpu.matmul %0, %1, %cst {dimension_numbers = #tpu.dot_dimension_numbers<[1], [0], [0], [1], [0, 0, 1, 1], [], []>} : vector<16x128xbf16>, vector<128x128xbf16>, vector<16x128xf32> -> vector<16x128xf32>
    %c0_3 = arith.constant 0 : index
    %c0_4 = arith.constant 0 : index
    %3 = vector.load %arg3[%c0_3, %c0_4] : memref<1x128xf32, #tpu.memory_space<vmem>>, vector<1x128xf32>
    %4 = vector.broadcast %3 : vector<1x128xf32> to vector<16x128xf32>
    %5 = arith.addf %2, %4 : vector<16x128xf32>
    %cst_5 = arith.constant 0.000000e+00 : f32
    %6 = vector.broadcast %cst_5 : f32 to vector<16x128xf32>
    %7 = arith.maximumf %5, %6 : vector<16x128xf32>
    %8 = arith.truncf %7 : vector<16x128xf32> to vector<16x128xbf16>
    %c0_6 = arith.constant 0 : index
    %c0_7 = arith.constant 0 : index
    %9 = vector.load %arg4[%c0_6, %c0_7] : memref<128x128xbf16, #tpu.memory_space<vmem>>, vector<128x128xbf16>
    %cst_8 = arith.constant dense<0.000000e+00> : vector<16x128xf32>
    %10 = tpu.matmul %8, %9, %cst_8 {dimension_numbers = #tpu.dot_dimension_numbers<[1], [0], [0], [1], [0, 0, 1, 1], [], []>} : vector<16x128xbf16>, vector<128x128xbf16>, vector<16x128xf32> -> vector<16x128xf32>
    %c0_9 = arith.constant 0 : index
    %c0_10 = arith.constant 0 : index
    %11 = vector.load %arg5[%c0_9, %c0_10] : memref<1x128xf32, #tpu.memory_space<vmem>>, vector<1x128xf32>
    %12 = vector.broadcast %11 : vector<1x128xf32> to vector<16x128xf32>
    %13 = arith.addf %10, %12 : vector<16x128xf32>
    %cst_11 = arith.constant 0.000000e+00 : f32
    %14 = vector.broadcast %cst_11 : f32 to vector<16x128xf32>
    %15 = arith.maximumf %13, %14 : vector<16x128xf32>
    %16 = arith.truncf %15 : vector<16x128xf32> to vector<16x128xbf16>
    %c0_12 = arith.constant 0 : index
    %c0_13 = arith.constant 0 : index
    %17 = vector.load %arg10[%c0_12, %c0_13] : memref<16x128xbf16, #tpu.memory_space<vmem>>, vector<16x128xbf16>
    tpu.vector_store %arg10[%c0_12, %c0_13], %16 {strides = array<i32>} : memref<16x128xbf16, #tpu.memory_space<vmem>>, vector<16x128xbf16>,
    %c0_14 = arith.constant 0 : index
    %c0_15 = arith.constant 0 : index
    %18 = vector.load %arg6[%c0_14, %c0_15] : memref<128x128xbf16, #tpu.memory_space<vmem>>, vector<128x128xbf16>
    %cst_16 = arith.constant dense<0.000000e+00> : vector<16x128xf32>
    %19 = tpu.matmul %16, %18, %cst_16 {dimension_numbers = #tpu.dot_dimension_numbers<[1], [0], [0], [1], [0, 0, 1, 1], [], []>} : vector<16x128xbf16>, vector<128x128xbf16>, vector<16x128xf32> -> vector<16x128xf32>
    %c0_17 = arith.constant 0 : index
    %c0_18 = arith.constant 0 : index
    %20 = vector.load %arg7[%c0_17, %c0_18] : memref<1x128xf32, #tpu.memory_space<vmem>>, vector<1x128xf32>
    %21 = vector.broadcast %20 : vector<1x128xf32> to vector<16x128xf32>
    %22 = arith.addf %19, %21 : vector<16x128xf32>
    %cst_19 = arith.constant 0.000000e+00 : f32
    %23 = vector.broadcast %cst_19 : f32 to vector<16x128xf32>
    %24 = arith.maximumf %22, %23 : vector<16x128xf32>
    %25 = arith.truncf %24 : vector<16x128xf32> to vector<16x128xbf16>
    %c0_20 = arith.constant 0 : index
    %c0_21 = arith.constant 0 : index
    %26 = vector.load %arg8[%c0_20, %c0_21] : memref<128x128xbf16, #tpu.memory_space<vmem>>, vector<128x128xbf16>
    %cst_22 = arith.constant dense<0.000000e+00> : vector<16x128xf32>
    %27 = tpu.matmul %25, %26, %cst_22 {dimension_numbers = #tpu.dot_dimension_numbers<[1], [0], [0], [1], [0, 0, 1, 1], [], []>} : vector<16x128xbf16>, vector<128x128xbf16>, vector<16x128xf32> -> vector<16x128xf32>
    %c0_23 = arith.constant 0 : index
    %c0_24 = arith.constant 0 : index
    %28 = vector.load %arg9[%c0_23, %c0_24] : memref<1x128xf32, #tpu.memory_space<vmem>>, vector<1x128xf32>
    %29 = vector.broadcast %28 : vector<1x128xf32> to vector<16x128xf32>
    %30 = arith.addf %27, %29 : vector<16x128xf32>
    %31 = arith.negf %30 : vector<16x128xf32>
    %32 = math.exp %31 : vector<16x128xf32>
    %cst_25 = arith.constant 1.000000e+00 : f32
    %33 = vector.broadcast %cst_25 : f32 to vector<16x128xf32>
    %34 = arith.addf %33, %32 : vector<16x128xf32>
    %35 = arith.divf %33, %34 : vector<16x128xf32>
    %36 = arith.truncf %35 : vector<16x128xf32> to vector<16x128xbf16>
    %c0_26 = arith.constant 0 : index
    %c0_27 = arith.constant 0 : index
    %37 = vector.load %arg11[%c0_26, %c0_27] : memref<16x128xbf16, #tpu.memory_space<vmem>>, vector<16x128xbf16>
    tpu.vector_store %arg11[%c0_26, %c0_27], %36 {strides = array<i32>} : memref<16x128xbf16, #tpu.memory_space<vmem>>, vector<16x128xbf16>,
    return
  }
  func.func @transform_0(%arg0: i32) -> (i32, i32) {
    %c0_i32 = arith.constant 0 : i32
    %c0_i32_0 = arith.constant 0 : i32
    return %arg0, %c0_i32 : i32, i32
  }
  func.func @transform_1(%arg0: i32) -> (i32, i32) {
    %c0_i32 = arith.constant 0 : i32
    %c0_i32_0 = arith.constant 0 : i32
    %c0_i32_1 = arith.constant 0 : i32
    return %c0_i32, %c0_i32_0 : i32, i32
  }
  func.func @transform_2(%arg0: i32) -> (i32, i32) {
    %c0_i32 = arith.constant 0 : i32
    %c0_i32_0 = arith.constant 0 : i32
    %c0_i32_1 = arith.constant 0 : i32
    return %c0_i32, %c0_i32_0 : i32, i32
  }
  func.func @transform_3(%arg0: i32) -> (i32, i32) {
    %c0_i32 = arith.constant 0 : i32
    %c0_i32_0 = arith.constant 0 : i32
    %c0_i32_1 = arith.constant 0 : i32
    return %c0_i32, %c0_i32_0 : i32, i32
  }
  func.func @transform_4(%arg0: i32) -> (i32, i32) {
    %c0_i32 = arith.constant 0 : i32
    %c0_i32_0 = arith.constant 0 : i32
    %c0_i32_1 = arith.constant 0 : i32
    return %c0_i32, %c0_i32_0 : i32, i32
  }
  func.func @transform_5(%arg0: i32) -> (i32, i32) {
    %c0_i32 = arith.constant 0 : i32
    %c0_i32_0 = arith.constant 0 : i32
    %c0_i32_1 = arith.constant 0 : i32
    return %c0_i32, %c0_i32_0 : i32, i32
  }
  func.func @transform_6(%arg0: i32) -> (i32, i32) {
    %c0_i32 = arith.constant 0 : i32
    %c0_i32_0 = arith.constant 0 : i32
    %c0_i32_1 = arith.constant 0 : i32
    return %c0_i32, %c0_i32_0 : i32, i32
  }
  func.func @transform_7(%arg0: i32) -> (i32, i32) {
    %c0_i32 = arith.constant 0 : i32
    %c0_i32_0 = arith.constant 0 : i32
    %c0_i32_1 = arith.constant 0 : i32
    return %c0_i32, %c0_i32_0 : i32, i32
  }
  func.func @transform_8(%arg0: i32) -> (i32, i32) {
    %c0_i32 = arith.constant 0 : i32
    %c0_i32_0 = arith.constant 0 : i32
    %c0_i32_1 = arith.constant 0 : i32
    return %c0_i32, %c0_i32_0 : i32, i32
  }
  func.func @transform_9(%arg0: i32) -> (i32, i32) {
    %c0_i32 = arith.constant 0 : i32
    %c0_i32_0 = arith.constant 0 : i32
    return %arg0, %c0_i32 : i32, i32
  }
  func.func @transform_10(%arg0: i32) -> (i32, i32) {
    %c0_i32 = arith.constant 0 : i32
    %c0_i32_0 = arith.constant 0 : i32
    return %arg0, %c0_i32 : i32, i32
  }
}

module attributes {stable_mosaic.version = 11 : i64} {
  func.func @_fused_mlp_kernel(%arg0: i32, %arg1: memref<16x128xbf16, #tpu.memory_space<vmem>>, %arg2: memref<128x128xbf16, #tpu.memory_space<vmem>>, %arg3: memref<1x128xf32, #tpu.memory_space<vmem>>, %arg4: memref<128x128xbf16, #tpu.memory_space<vmem>>, %arg5: memref<1x128xf32, #tpu.memory_space<vmem>>, %arg6: memref<128x128xbf16, #tpu.memory_space<vmem>>, %arg7: memref<1x128xf32, #tpu.memory_space<vmem>>, %arg8: memref<128x128xbf16, #tpu.memory_space<vmem>>, %arg9: memref<1x128xf32, #tpu.memory_space<vmem>>, %arg10: memref<16x128xbf16, #tpu.memory_space<vmem>>, %arg11: memref<16x128xbf16, #tpu.memory_space<vmem>>) attributes {dimension_semantics = [#tpu.dimension_semantics<parallel>], iteration_bounds = array<i64: 1>, scalar_prefetch = 0 : i64, scratch_operands = 0 : i64, tpu.core_type = #tpu.core_type<tc>, window_params = [{transform_indices = @transform_0, window_bounds = array<i64: 16, 128>}, {pipeline_mode = #tpu.pipeline_mode<synchronous>, transform_indices = @transform_1, window_bounds = array<i64: 128, 128>}, {pipeline_mode = #tpu.pipeline_mode<synchronous>, transform_indices = @transform_2, window_bounds = array<i64: 1, 128>}, {pipeline_mode = #tpu.pipeline_mode<synchronous>, transform_indices = @transform_3, window_bounds = array<i64: 128, 128>}, {pipeline_mode = #tpu.pipeline_mode<synchronous>, transform_indices = @transform_4, window_bounds = array<i64: 1, 128>}, {pipeline_mode = #tpu.pipeline_mode<synchronous>, transform_indices = @transform_5, window_bounds = array<i64: 128, 128>}, {pipeline_mode = #tpu.pipeline_mode<synchronous>, transform_indices = @transform_6, window_bounds = array<i64: 1, 128>}, {pipeline_mode = #tpu.pipeline_mode<synchronous>, transform_indices = @transform_7, window_bounds = array<i64: 128, 128>}, {pipeline_mode = #tpu.pipeline_mode<synchronous>, transform_indices = @transform_8, window_bounds = array<i64: 1, 128>}, {transform_indices = @transform_9, window_bounds = array<i64: 16, 128>}, {transform_indices = @transform_10, window_bounds = array<i64: 16, 128>}]} {
    %c0 = arith.constant 0 : index
    %c0_0 = arith.constant 0 : index
    %0 = vector.load %arg1[%c0, %c0_0] : memref<16x128xbf16, #tpu.memory_space<vmem>>, vector<16x128xbf16>
    %c0_1 = arith.constant 0 : index
    %c0_2 = arith.constant 0 : index
    %1 = vector.load %arg2[%c0_1, %c0_2] : memref<128x128xbf16, #tpu.memory_space<vmem>>, vector<128x128xbf16>
    %cst = arith.constant dense<0.000000e+00> : vector<16x128xf32>
    %2 = tpu.matmul %0, %1, %cst {dimension_numbers = #tpu.dot_dimension_numbers<[1], [0], [0], [1], [0, 0, 1, 1], [], []>} : vector<16x128xbf16>, vector<128x128xbf16>, vector<16x128xf32> -> vector<16x128xf32>
    %c0_3 = arith.constant 0 : index
    %c0_4 = arith.constant 0 : index
    %3 = vector.load %arg3[%c0_3, %c0_4] : memref<1x128xf32, #tpu.memory_space<vmem>>, vector<1x128xf32>
    %4 = vector.broadcast %3 : vector<1x128xf32> to vector<16x128xf32>
    %5 = arith.addf %2, %4 : vector<16x128xf32>
    %cst_5 = arith.constant 0.000000e+00 : f32
    %6 = vector.broadcast %cst_5 : f32 to vector<16x128xf32>
    %7 = arith.maximumf %5, %6 : vector<16x128xf32>
    %8 = arith.truncf %7 : vector<16x128xf32> to vector<16x128xbf16>
    %c0_6 = arith.constant 0 : index
    %c0_7 = arith.constant 0 : index
    %9 = vector.load %arg4[%c0_6, %c0_7] : memref<128x128xbf16, #tpu.memory_space<vmem>>, vector<128x128xbf16>
    %cst_8 = arith.constant dense<0.000000e+00> : vector<16x128xf32>
    %10 = tpu.matmul %8, %9, %cst_8 {dimension_numbers = #tpu.dot_dimension_numbers<[1], [0], [0], [1], [0, 0, 1, 1], [], []>} : vector<16x128xbf16>, vector<128x128xbf16>, vector<16x128xf32> -> vector<16x128xf32>
    %c0_9 = arith.constant 0 : index
    %c0_10 = arith.constant 0 : index
    %11 = vector.load %arg5[%c0_9, %c0_10] : memref<1x128xf32, #tpu.memory_space<vmem>>, vector<1x128xf32>
    %12 = vector.broadcast %11 : vector<1x128xf32> to vector<16x128xf32>
    %13 = arith.addf %10, %12 : vector<16x128xf32>
    %cst_11 = arith.constant 0.000000e+00 : f32
    %14 = vector.broadcast %cst_11 : f32 to vector<16x128xf32>
    %15 = arith.maximumf %13, %14 : vector<16x128xf32>
    %16 = arith.truncf %15 : vector<16x128xf32> to vector<16x128xbf16>
    %c0_12 = arith.constant 0 : index
    %c0_13 = arith.constant 0 : index
    %17 = vector.load %arg10[%c0_12, %c0_13] : memref<16x128xbf16, #tpu.memory_space<vmem>>, vector<16x128xbf16>
    tpu.vector_store %arg10[%c0_12, %c0_13], %16 {strides = array<i32>} : memref<16x128xbf16, #tpu.memory_space<vmem>>, vector<16x128xbf16>,
    %c0_14 = arith.constant 0 : index
    %c0_15 = arith.constant 0 : index
    %18 = vector.load %arg6[%c0_14, %c0_15] : memref<128x128xbf16, #tpu.memory_space<vmem>>, vector<128x128xbf16>
    %cst_16 = arith.constant dense<0.000000e+00> : vector<16x128xf32>
    %19 = tpu.matmul %16, %18, %cst_16 {dimension_numbers = #tpu.dot_dimension_numbers<[1], [0], [0], [1], [0, 0, 1, 1], [], []>} : vector<16x128xbf16>, vector<128x128xbf16>, vector<16x128xf32> -> vector<16x128xf32>
    %c0_17 = arith.constant 0 : index
    %c0_18 = arith.constant 0 : index
    %20 = vector.load %arg7[%c0_17, %c0_18] : memref<1x128xf32, #tpu.memory_space<vmem>>, vector<1x128xf32>
    %21 = vector.broadcast %20 : vector<1x128xf32> to vector<16x128xf32>
    %22 = arith.addf %19, %21 : vector<16x128xf32>
    %cst_19 = arith.constant 0.000000e+00 : f32
    %23 = vector.broadcast %cst_19 : f32 to vector<16x128xf32>
    %24 = arith.maximumf %22, %23 : vector<16x128xf32>
    %25 = arith.truncf %24 : vector<16x128xf32> to vector<16x128xbf16>
    %c0_20 = arith.constant 0 : index
    %c0_21 = arith.constant 0 : index
    %26 = vector.load %arg8[%c0_20, %c0_21] : memref<128x128xbf16, #tpu.memory_space<vmem>>, vector<128x128xbf16>
    %cst_22 = arith.constant dense<0.000000e+00> : vector<16x128xf32>
    %27 = tpu.matmul %25, %26, %cst_22 {dimension_numbers = #tpu.dot_dimension_numbers<[1], [0], [0], [1], [0, 0, 1, 1], [], []>} : vector<16x128xbf16>, vector<128x128xbf16>, vector<16x128xf32> -> vector<16x128xf32>
    %c0_23 = arith.constant 0 : index
    %c0_24 = arith.constant 0 : index
    %28 = vector.load %arg9[%c0_23, %c0_24] : memref<1x128xf32, #tpu.memory_space<vmem>>, vector<1x128xf32>
    %29 = vector.broadcast %28 : vector<1x128xf32> to vector<16x128xf32>
    %30 = arith.addf %27, %29 : vector<16x128xf32>
    %31 = arith.negf %30 : vector<16x128xf32>
    %32 = math.exp %31 : vector<16x128xf32>
    %cst_25 = arith.constant 1.000000e+00 : f32
    %33 = vector.broadcast %cst_25 : f32 to vector<16x128xf32>
    %34 = arith.addf %33, %32 : vector<16x128xf32>
    %35 = arith.divf %33, %34 : vector<16x128xf32>
    %36 = arith.truncf %35 : vector<16x128xf32> to vector<16x128xbf16>
    %c0_26 = arith.constant 0 : index
    %c0_27 = arith.constant 0 : index
    %37 = vector.load %arg11[%c0_26, %c0_27] : memref<16x128xbf16, #tpu.memory_space<vmem>>, vector<16x128xbf16>
    tpu.vector_store %arg11[%c0_26, %c0_27], %36 {strides = array<i32>} : memref<16x128xbf16, #tpu.memory_space<vmem>>, vector<16x128xbf16>,
    return
  }
  func.func @transform_0(%arg0: i32) -> (i32, i32) {
    %c0_i32 = arith.constant 0 : i32
    %c0_i32_0 = arith.constant 0 : i32
    return %arg0, %c0_i32 : i32, i32
  }
  func.func @transform_1(%arg0: i32) -> (i32, i32) {
    %c0_i32 = arith.constant 0 : i32
    %c0_i32_0 = arith.constant 0 : i32
    %c0_i32_1 = arith.constant 0 : i32
    return %c0_i32, %c0_i32_0 : i32, i32
  }
  func.func @transform_2(%arg0: i32) -> (i32, i32) {
    %c0_i32 = arith.constant 0 : i32
    %c0_i32_0 = arith.constant 0 : i32
    %c0_i32_1 = arith.constant 0 : i32
    return %c0_i32, %c0_i32_0 : i32, i32
  }
  func.func @transform_3(%arg0: i32) -> (i32, i32) {
    %c0_i32 = arith.constant 0 : i32
    %c0_i32_0 = arith.constant 0 : i32
    %c0_i32_1 = arith.constant 0 : i32
    return %c0_i32, %c0_i32_0 : i32, i32
  }
  func.func @transform_4(%arg0: i32) -> (i32, i32) {
    %c0_i32 = arith.constant 0 : i32
    %c0_i32_0 = arith.constant 0 : i32
    %c0_i32_1 = arith.constant 0 : i32
    return %c0_i32, %c0_i32_0 : i32, i32
  }
  func.func @transform_5(%arg0: i32) -> (i32, i32) {
    %c0_i32 = arith.constant 0 : i32
    %c0_i32_0 = arith.constant 0 : i32
    %c0_i32_1 = arith.constant 0 : i32
    return %c0_i32, %c0_i32_0 : i32, i32
  }
  func.func @transform_6(%arg0: i32) -> (i32, i32) {
    %c0_i32 = arith.constant 0 : i32
    %c0_i32_0 = arith.constant 0 : i32
    %c0_i32_1 = arith.constant 0 : i32
    return %c0_i32, %c0_i32_0 : i32, i32
  }
  func.func @transform_7(%arg0: i32) -> (i32, i32) {
    %c0_i32 = arith.constant 0 : i32
    %c0_i32_0 = arith.constant 0 : i32
    %c0_i32_1 = arith.constant 0 : i32
    return %c0_i32, %c0_i32_0 : i32, i32
  }
  func.func @transform_8(%arg0: i32) -> (i32, i32) {
    %c0_i32 = arith.constant 0 : i32
    %c0_i32_0 = arith.constant 0 : i32
    %c0_i32_1 = arith.constant 0 : i32
    return %c0_i32, %c0_i32_0 : i32, i32
  }
  func.func @transform_9(%arg0: i32) -> (i32, i32) {
    %c0_i32 = arith.constant 0 : i32
    %c0_i32_0 = arith.constant 0 : i32
    return %arg0, %c0_i32 : i32, i32
  }
  func.func @transform_10(%arg0: i32) -> (i32, i32) {
    %c0_i32 = arith.constant 0 : i32
    %c0_i32_0 = arith.constant 0 : i32
    return %arg0, %c0_i32 : i32, i32
  }
}

</mosaic_0001>

<bundles_post_ra>
// kernel: tpu_custom_call.1
= control target key start
LH: loop header
LB: loop body
LE: loop exit
PB: predicated region body
PF: predicated region fallthrough
CT: control target
= control target key end

     0   :  { %16 = vsyncpa [#allocation3], 0  ;;  %s1262_s0 = inlined_call_operand.hbm [shape: bf16[16,128], index: 0, kind: input, shape index: {}]   ;;  %s1263_s1 = inlined_call_operand.hbm [shape: bf16[128,128], index: 1, kind: input, shape index: {}]   ;;  %s1264_s2 = inlined_call_operand.vmem [shape: f32[1,128], index: 2, kind: input, shape index: {}]   ;;  %s1265_s3 = inlined_call_operand.hbm [shape: bf16[128,128], index: 3, kind: input, shape index: {}]   ;;  %s1266_s4 = inlined_call_operand.vmem [shape: f32[1,128], index: 4, kind: input, shape index: {}]   ;;  %s1267_s5 = inlined_call_operand.hbm [shape: bf16[128,128], index: 5, kind: input, shape index: {}]   ;;  %s1268_s6 = inlined_call_operand.vmem [shape: f32[1,128], index: 6, kind: input, shape index: {}]   ;;  %s1269_s7 = inlined_call_operand.hbm [shape: bf16[128,128], index: 7, kind: input, shape index: {}]   ;;  %s1270_s8 = inlined_call_operand.vmem [shape: f32[1,128], index: 8, kind: input, shape index: {}]   ;;  %s1271_s9 = inlined_call_operand.hbm [shape: bf16[16,128], index: 9, kind: output, shape index: {0}]   ;;  %s1272_s10 = inlined_call_operand.hbm [shape: bf16[16,128], index: 10, kind: output, shape index: {1}]  }
   0x1   :  { %17 = vsyncpa [#allocation6], 0 }
   0x2   :  { %18 = vsyncpa [#allocation9], 0 }
   0x3   :  { %19 = vsyncpa [#allocation4], 0 }
   0x4   :  { %20 = vsyncpa [#allocation13], 0  ;;  %s1025_s13 = smov [#allocation5]   ;;  %s1026_s15 = smov [#allocation8]  }
   0x5   :  { %s38_s14 = sshll.u32 %s1025_s13, 4  ;;  %s66_s16 = sshll.u32 %s1026_s15, 4  ;;  %s39_s14 = int_to_ptr.vmem [resolvable:$true] %s38_s14  ;;  %s1091_s16 = int_to_ptr.vmem [resolvable:$true] %s66_s16 }
   0x6   :  { %s861_s19 = scalar_lea.hbm %s1263_s1, 1024 }
   0x7   :  { %p862_p0 = scmp.ne.s32.totalorder %s1263_s1, %s861_s19  ;;  %p865_p1 = scmp.lt.u32.totalorder %s861_s19, %s1263_s1 }
   0x9   :  { %p867_p2 = pnand %p865_p1, %p862_p0 }
   0xb   :  { %870 = shalt.err (!%p867_p2)
}
   0xc   :  { %s871_s24 = scalar_lea.vmem %s39_s14, 1024  ;;  %p876_p4 = scmp.lt.s32.totalorder %s39_s14, %s39_s14 }
   0xd   :  { %p872_p3 = scmp.ne.s32.totalorder %s39_s14, %s871_s24  ;;  %p877_p5 = scmp.lt.s32.totalorder %s871_s24, %s871_s24 }
   0xf   :  { %p878_p6 = por %p877_p5, %p876_p4 }
  0x11   :  { %p879_p7 = pnand %p878_p6, %p872_p3 }
  0x13   :  { %882 = shalt.err (!%p879_p7)
}
  0x14   :  { %s1027_s25 = smov 64   ;;  %s1028_s26 = smov 4  }
  0x15   :  { %44 = dma.hbm_to_vmem [thread:$0]  %s1263_s1, 1024, %s39_s14, [#allocation6], %s1027_s25, %s1027_s25, %s1028_s26  }
  0x16   :  { %s883_s11 = scalar_lea.hbm %s1267_s5, 1024 }
  0x17   :  { %p884_p8 = scmp.ne.s32.totalorder %s1267_s5, %s883_s11  ;;  %p887_p9 = scmp.lt.u32.totalorder %s883_s11, %s1267_s5 }
  0x19   :  { %p889_p10 = pnand %p887_p9, %p884_p8 }
  0x1b   :  { %892 = shalt.err (!%p889_p10)
}
  0x1c   :  { %s893_s18 = scalar_lea.vmem %s1091_s16, 1024  ;;  %p898_p12 = scmp.lt.s32.totalorder %s1091_s16, %s1091_s16 }
  0x1d   :  { %p894_p11 = scmp.ne.s32.totalorder %s1091_s16, %s893_s18  ;;  %p899_p13 = scmp.lt.s32.totalorder %s893_s18, %s893_s18 }
  0x1f   :  { %p900_p0 = por %p899_p13, %p898_p12 }
  0x21   :  { %p901_p1 = pnand %p900_p0, %p894_p11 }
  0x23   :  { %904 = shalt.err (!%p901_p1)
}
  0x24   :  { %72 = dma.hbm_to_vmem [thread:$0]  %s1267_s5, 1024, %s1091_s16, [#allocation9], %s1027_s25, %s1027_s25, %s1028_s26  }
  0x25   :  { %s1029_s19 = smov [#allocation2]   ;;  %s1030_s21 = smov [#allocation7]  }
  0x26   :  { %s26_s20 = sshll.u32 %s1029_s19, 4  ;;  %s52_s22 = sshll.u32 %s1030_s21, 4  ;;  %s27_s20 = int_to_ptr.vmem [resolvable:$true] %s26_s20  ;;  %s1128_s22 = int_to_ptr.vmem [resolvable:$true] %s52_s22 }
  0x27   :  { %s905_s27 = scalar_lea.hbm %s1262_s0, 128 }
  0x28   :  { %p906_p2 = scmp.ne.s32.totalorder %s1262_s0, %s905_s27  ;;  %p909_p3 = scmp.lt.u32.totalorder %s905_s27, %s1262_s0 }
  0x2a   :  { %p911_p4 = pnand %p909_p3, %p906_p2 }
  0x2c   :  { %914 = shalt.err (!%p911_p4)
}
  0x2d   :  { %s915_s5 = scalar_lea.vmem %s27_s20, 128  ;;  %p920_p6 = scmp.lt.s32.totalorder %s27_s20, %s27_s20 }
  0x2e   :  { %p916_p5 = scmp.ne.s32.totalorder %s27_s20, %s915_s5  ;;  %p921_p7 = scmp.lt.s32.totalorder %s915_s5, %s915_s5 }
  0x30   :  { %p922_p8 = por %p921_p7, %p920_p6 }
  0x32   :  { %p923_p9 = pnand %p922_p8, %p916_p5 }
  0x34   :  { %926 = shalt.err (!%p923_p9)
}
  0x35   :  { %32 = dma.hbm_to_vmem [thread:$0]  %s1262_s0, 128, %s27_s20, [#allocation3], %s1027_s25, %s1027_s25, %s1028_s26  }
  0x36   :  { %s927_s17 = scalar_lea.hbm %s1265_s3, 1024 }
  0x37   :  { %p928_p10 = scmp.ne.s32.totalorder %s1265_s3, %s927_s17  ;;  %p931_p11 = scmp.lt.u32.totalorder %s927_s17, %s1265_s3 }
  0x39   :  { %p933_p12 = pnand %p931_p11, %p928_p10 }
  0x3b   :  { %936 = shalt.err (!%p933_p12)
}
  0x3c   :  { %s937_s21 = scalar_lea.vmem %s1128_s22, 1024  ;;  %p942_p0 = scmp.lt.s32.totalorder %s1128_s22, %s1128_s22 }
  0x3d   :  { %p938_p13 = scmp.ne.s32.totalorder %s1128_s22, %s937_s21  ;;  %p943_p1 = scmp.lt.s32.totalorder %s937_s21, %s937_s21 }
  0x3f   :  { %p944_p2 = por %p943_p1, %p942_p0 }
  0x41   :  { %p945_p3 = pnand %p944_p2, %p938_p13 }
  0x43   :  { %948 = shalt.err (!%p945_p3)
}
  0x44   :  { %58 = dma.hbm_to_vmem [thread:$0]  %s1265_s3, 1024, %s1128_s22, [#allocation6], %s1027_s25, %s1027_s25, %s1028_s26  }
  0x45   :  { %s1031_s23 = smov [#allocation10]   ;;  %s949_s29 = scalar_lea.hbm %s1269_s7, 1024 }
  0x46   :  { %s80_s24 = sshll.u32 %s1031_s23, 4  ;;  %p950_p4 = scmp.ne.s32.totalorder %s1269_s7, %s949_s29  ;;  %s81_s24 = int_to_ptr.vmem [resolvable:$true] %s80_s24 }
  0x47   :  { %p953_p5 = scmp.lt.u32.totalorder %s949_s29, %s1269_s7 }
  0x49   :  { %p955_p6 = pnand %p953_p5, %p950_p4 }
  0x4b   :  { %958 = shalt.err (!%p955_p6)
}
  0x4c   :  { %s959_s12 = scalar_lea.vmem %s81_s24, 1024  ;;  %p964_p8 = scmp.lt.s32.totalorder %s81_s24, %s81_s24 }
  0x4d   :  { %p960_p7 = scmp.ne.s32.totalorder %s81_s24, %s959_s12  ;;  %p965_p9 = scmp.lt.s32.totalorder %s959_s12, %s959_s12 }
  0x4f   :  { %p966_p10 = por %p965_p9, %p964_p8 }
  0x51   :  { %p967_p11 = pnand %p966_p10, %p960_p7 }
  0x53   :  { %970 = shalt.err (!%p967_p11)
}
  0x54   :  { %86 = dma.hbm_to_vmem [thread:$0]  %s1269_s7, 1024, %s81_s24, [#allocation9], %s1027_s25, %s1027_s25, %s1028_s26  }
  0x55   :  { %1015 = dma.done.wait [#allocation3], 128  }
  0x56   :  { %1016 = vsyncadd [#allocation3], 4294967168 }
  0x57   :  { %1017 = dma.done.wait [#allocation6], 2048  }
  0x58   :  { %1018 = vsyncadd [#allocation6], 4294965248 }
  0x59   :  { %1019 = dma.done.wait [#allocation9], 2048  }
  0x5a   :  { %1020 = vsyncadd [#allocation9], 4294965248  ;;  %v1032_v0 = vmov 0.0   ;;  %vm1033_vm0 = vmmov 0   ;;  %v820_v1 = vld [vmem:[#allocation5] sm:$0xff]   ;;  %v821_v2 = vld [vmem:[#allocation5 + $0x8] sm:$0xff]  }
  0x5b   :  { %729 = vmatprep.subr.bf16.mxu0 %v1032_v0  ;;  %745 = vmatprep.mubr.msk.bf16.mxu0 %vm1033_vm0, %v1032_v0  ;;  %v822_v3 = vld [vmem:[#allocation5 + $0x10] sm:$0xff]   ;;  %v829_v4 = vld [vmem:[#allocation7] sm:$0xff]   ;;  %v823_v5 = vld [vmem:[#allocation5 + $0x18] sm:$0xff]  }
  0x5c   :  { %749 = vmatprep.subr.bf16.mxu1 %v1032_v0  ;;  %765 = vmatprep.mubr.msk.bf16.mxu1 %vm1033_vm0, %v1032_v0  ;;  %v830_v6 = vld [vmem:[#allocation7 + $0x8] sm:$0xff]   ;;  %v824_v7 = vld [vmem:[#allocation5 + $0x20] sm:$0xff]   ;;  %v831_v8 = vld [vmem:[#allocation7 + $0x10] sm:$0xff]  }
  0x5d   :  { %730 = vmatpush3.bf16.msra.mxu0 %v820_v1  ;;  %750 = vmatpush3.bf16.msra.mxu1 %v829_v4  ;;  %v825_v9 = vld [vmem:[#allocation5 + $0x28] sm:$0xff]   ;;  %v832_v10 = vld [vmem:[#allocation7 + $0x18] sm:$0xff]   ;;  %v826_v11 = vld [vmem:[#allocation5 + $0x30] sm:$0xff]  }
  0x5e   :  { %731 = vmatprep.subr.bf16.mxu0 %v1032_v0  ;;  %751 = vmatprep.subr.bf16.mxu1 %v1032_v0  ;;  %v833_v12 = vld [vmem:[#allocation7 + $0x20] sm:$0xff]   ;;  %v827_v13 = vld [vmem:[#allocation5 + $0x38] sm:$0xff]   ;;  %v834_v14 = vld [vmem:[#allocation7 + $0x28] sm:$0xff]  }
  0x5f   :  { %v828_v15 = vld [vmem:[#allocation2] sm:$0xff]   ;;  %v835_v16 = vld [vmem:[#allocation7 + $0x30] sm:$0xff]   ;;  %v837_v18 = vld [vmem:[#allocation8] sm:$0xff]  }
  0x60   :  { %v836_v17 = vld [vmem:[#allocation7 + $0x38] sm:$0xff]   ;;  %v838_v19 = vld [vmem:[#allocation8 + $0x8] sm:$0xff]   ;;  %v839_v20 = vld [vmem:[#allocation8 + $0x10] sm:$0xff]  }
  0x61   :  { %732 = vmatpush3.bf16.msra.mxu0 %v821_v2  ;;  %752 = vmatpush3.bf16.msra.mxu1 %v830_v6  ;;  %v840_v21 = vld [vmem:[#allocation8 + $0x18] sm:$0xff]   ;;  %v841_v22 = vld [vmem:[#allocation8 + $0x20] sm:$0xff]   ;;  %v842_v23 = vld [vmem:[#allocation8 + $0x28] sm:$0xff]  }
  0x62   :  { %733 = vmatprep.subr.bf16.mxu0 %v1032_v0  ;;  %753 = vmatprep.subr.bf16.mxu1 %v1032_v0  ;;  %v636_v24 = vld [vmem:[%s1264_s2] ss:$0 sm:$0xff]  ;;  %v843_v34 = vld [vmem:[#allocation8 + $0x30] sm:$0xff]   ;;  %v845_v36 = vld [vmem:[#allocation10] sm:$0xff]  }
  0x63   :  { %v844_v35 = vld [vmem:[#allocation8 + $0x38] sm:$0xff]   ;;  %v846_v37 = vld [vmem:[#allocation10 + $0x8] sm:$0xff]   ;;  %v847_v38 = vld [vmem:[#allocation10 + $0x10] sm:$0xff]  }
  0x64   :  { %v848_v39 = vld [vmem:[#allocation10 + $0x18] sm:$0xff]   ;;  %v849_v40 = vld [vmem:[#allocation10 + $0x20] sm:$0xff]   ;;  %v850_v41 = vld [vmem:[#allocation10 + $0x28] sm:$0xff]  }
  0x65   :  { %734 = vmatpush3.bf16.msra.mxu0 %v822_v3  ;;  %754 = vmatpush3.bf16.msra.mxu1 %v831_v8  ;;  %v646_v42 = vld [vmem:[%s1266_s4] ss:$0 sm:$0xff]  ;;  %v851_v52 = vld [vmem:[#allocation10 + $0x30] sm:$0xff]   ;;  %s1034_s4 = smov [#allocation11]  }
  0x66   :  { %735 = vmatprep.subr.bf16.mxu0 %v1032_v0  ;;  %755 = vmatprep.subr.bf16.mxu1 %v1032_v0  ;;  %v852_v53 = vld [vmem:[#allocation10 + $0x38] sm:$0xff]   ;;  %s606_s1 = sshll.u32 %s1034_s4, 4  ;;  %s607_s1 = int_to_ptr.vmem [resolvable:$true] %s606_s1 }
  0x67   :  { %v657_v54 = vld [vmem:[%s1268_s6] ss:$0 sm:$0xff]  ;;  %s971_s14 = scalar_lea.vmem %s607_s1, 128  ;;  %p976_p13 = scmp.lt.s32.totalorder %s607_s1, %s607_s1 }
  0x68   :  { %p972_p12 = scmp.ne.s32.totalorder %s607_s1, %s971_s14  ;;  %p977_p0 = scmp.lt.s32.totalorder %s971_s14, %s971_s14 }
  0x69   :  { %736 = vmatpush3.bf16.msra.mxu0 %v823_v5  ;;  %756 = vmatpush3.bf16.msra.mxu1 %v832_v10 }
  0x6a   :  { %737 = vmatprep.subr.bf16.mxu0 %v1032_v0  ;;  %757 = vmatprep.subr.bf16.mxu1 %v1032_v0  ;;  %p978_p1 = por %p977_p0, %p976_p13 }
  0x6c   :  { %p979_p2 = pnand %p978_p1, %p972_p12 }
  0x6d   :  { %738 = vmatpush3.bf16.msra.mxu0 %v824_v7  ;;  %758 = vmatpush3.bf16.msra.mxu1 %v833_v12 }
  0x6e   :  { %739 = vmatprep.subr.bf16.mxu0 %v1032_v0  ;;  %759 = vmatprep.subr.bf16.mxu1 %v1032_v0 }
  0x71   :  { %740 = vmatpush3.bf16.msra.mxu0 %v825_v9  ;;  %760 = vmatpush3.bf16.msra.mxu1 %v834_v14 }
  0x72   :  { %741 = vmatprep.subr.bf16.mxu0 %v1032_v0  ;;  %761 = vmatprep.subr.bf16.mxu1 %v1032_v0 }
  0x75   :  { %742 = vmatpush3.bf16.msra.mxu0 %v826_v11  ;;  %762 = vmatpush3.bf16.msra.mxu1 %v835_v16 }
  0x76   :  { %743 = vmatprep.subr.bf16.mxu0 %v1032_v0  ;;  %763 = vmatprep.subr.bf16.mxu1 %v1032_v0 }
  0x79   :  { %744 = vmatpush3.bf16.msra.mxu0 %v827_v13  ;;  %764 = vmatpush3.bf16.msra.mxu1 %v836_v17 }
  0x7a   :  { %769 = vmatprep.subr.bf16.mxu0 %v1032_v0  ;;  %789 = vmatprep.subr.bf16.mxu1 %v1032_v0 }
  0x7c   :  { %746 = vmatmul.mubr.bf16.vlgmr.msra.gmra.mrb[0].mxu0 %v828_v15 }
  0x7d   :  { %785 = vmatprep.mubr.msk.bf16.mxu0 %vm1033_vm0, %v1032_v0  ;;  %770 = vmatpush3.bf16.msra.mxu0 %v837_v18 }
  0x7e   :  { %771 = vmatprep.subr.bf16.mxu0 %v1032_v0 }
  0x81   :  { %772 = vmatpush3.bf16.msra.mxu0 %v838_v19 }
  0x82   :  { %773 = vmatprep.subr.bf16.mxu0 %v1032_v0 }
  0x85   :  { %774 = vmatpush3.bf16.msra.mxu0 %v839_v20 }
  0x86   :  { %775 = vmatprep.subr.bf16.mxu0 %v1032_v0 }
  0x89   :  { %776 = vmatpush3.bf16.msra.mxu0 %v840_v21 }
  0x8a   :  { %777 = vmatprep.subr.bf16.mxu0 %v1032_v0 }
  0x8d   :  { %778 = vmatpush3.bf16.msra.mxu0 %v841_v22 }
  0x8e   :  { %779 = vmatprep.subr.bf16.mxu0 %v1032_v0 }
  0x91   :  { %780 = vmatpush3.bf16.msra.mxu0 %v842_v23 }
  0x92   :  { %781 = vmatprep.subr.bf16.mxu0 %v1032_v0 }
  0x95   :  { %782 = vmatpush3.bf16.msra.mxu0 %v843_v34 }
  0x96   :  { %783 = vmatprep.subr.bf16.mxu0 %v1032_v0 }
  0x99   :  { %784 = vmatpush3.bf16.msra.mxu0 %v844_v35 }
 0x14f   :  { %v218_v25 = vpop.f32.mrb[0].mxu0 }
 0x150   :  { %v219_v26 = vadd.f32 %v636_v24, %v218_v25  ;;  %v747_v27 = vpop.f32.mrb[1].mxu0 }
 0x151   :  { %v221_v28 = vpop.f32.mrb[2].mxu0 }
 0x152   :  { %v222_v29 = vadd.f32 %v636_v24, %v221_v28  ;;  %v748_v30 = vpop.f32.mrb[3].mxu0  ;;  %v225_v31 = vmax.f32 %v219_v26, 0.0 }
 0x154   :  { %v226_v32 = vmax.f32 %v222_v29, 0.0 }
 0x156   :  { %v227_v33 = vpack.c.bf16 %v226_v32, %v225_v31 }
 0x158   :  { %766 = vmatmul.mubr.bf16.vlgmr.msra.gmra.mrb[0].mxu1 %v227_v33 }
 0x159   :  { %805 = vmatprep.mubr.msk.bf16.mxu1 %vm1033_vm0, %v1032_v0  ;;  %790 = vmatpush3.bf16.msra.mxu1 %v845_v36 }
 0x15a   :  { %791 = vmatprep.subr.bf16.mxu1 %v1032_v0 }
 0x15d   :  { %792 = vmatpush3.bf16.msra.mxu1 %v846_v37 }
 0x15e   :  { %793 = vmatprep.subr.bf16.mxu1 %v1032_v0 }
 0x161   :  { %794 = vmatpush3.bf16.msra.mxu1 %v847_v38 }
 0x162   :  { %795 = vmatprep.subr.bf16.mxu1 %v1032_v0 }
 0x165   :  { %796 = vmatpush3.bf16.msra.mxu1 %v848_v39 }
 0x166   :  { %797 = vmatprep.subr.bf16.mxu1 %v1032_v0 }
 0x169   :  { %798 = vmatpush3.bf16.msra.mxu1 %v849_v40 }
 0x16a   :  { %799 = vmatprep.subr.bf16.mxu1 %v1032_v0 }
 0x16d   :  { %800 = vmatpush3.bf16.msra.mxu1 %v850_v41 }
 0x16e   :  { %801 = vmatprep.subr.bf16.mxu1 %v1032_v0 }
 0x171   :  { %802 = vmatpush3.bf16.msra.mxu1 %v851_v52 }
 0x172   :  { %803 = vmatprep.subr.bf16.mxu1 %v1032_v0 }
 0x175   :  { %804 = vmatpush3.bf16.msra.mxu1 %v852_v53 }
 0x22b   :  { %v333_v43 = vpop.f32.mrb[0].mxu1 }
 0x22c   :  { %v334_v44 = vadd.f32 %v646_v42, %v333_v43  ;;  %v767_v45 = vpop.f32.mrb[1].mxu1 }
 0x22d   :  { %v336_v46 = vpop.f32.mrb[2].mxu1 }
 0x22e   :  { %v337_v47 = vadd.f32 %v646_v42, %v336_v46  ;;  %v768_v48 = vpop.f32.mrb[3].mxu1  ;;  %v340_v49 = vmax.f32 %v334_v44, 0.0 }
 0x230   :  { %v341_v50 = vmax.f32 %v337_v47, 0.0 }
 0x232   :  { %v342_v51 = vpack.c.bf16 %v341_v50, %v340_v49 }
 0x234   :  { %687 = vst [vmem:[#allocation11] sm:$0xff] %v342_v51   ;;  %786 = vmatmul.mubr.bf16.vlgmr.msra.gmra.mrb[4].mxu0 %v342_v51 }
 0x307   :  { %v457_v55 = vpop.f32.mrb[4].mxu0 }
 0x308   :  { %v458_v56 = vadd.f32 %v657_v54, %v457_v55  ;;  %v787_v57 = vpop.f32.mrb[5].mxu0 }
 0x309   :  { %v460_v58 = vpop.f32.mrb[6].mxu0 }
 0x30a   :  { %v461_v59 = vadd.f32 %v657_v54, %v460_v58  ;;  %v788_v60 = vpop.f32.mrb[7].mxu0  ;;  %v464_v61 = vmax.f32 %v458_v56, 0.0 }
 0x30c   :  { %v465_v62 = vmax.f32 %v461_v59, 0.0 }
 0x30e   :  { %v466_v63 = vpack.c.bf16 %v465_v62, %v464_v61 }
 0x310   :  { %806 = vmatmul.mubr.bf16.vlgmr.msra.gmra.mrb[4].mxu1 %v466_v63 }
 0x311   :  { %982 = shalt.err (!%p979_p2)
}
 0x312   :  { %s983_s21 = scalar_lea.hbm %s1271_s9, 128 }
 0x313   :  { %p984_p3 = scmp.ne.s32.totalorder %s1271_s9, %s983_s21  ;;  %p987_p4 = scmp.lt.u32.totalorder %s983_s21, %s1271_s9 }
 0x315   :  { %p989_p5 = pnand %p987_p4, %p984_p3 }
 0x317   :  { %992 = shalt.err (!%p989_p5)
}
 0x318   :  { %612 = dma.vmem_to_hbm [thread:$0]  %s607_s1, 128, %s1271_s9, [#allocation4], %s1027_s25, %s1027_s25, %s1028_s26  }
 0x319   :  { %v666_v0 = vld [vmem:[%s1270_s8] ss:$0 sm:$0xff]  ;;  %s1035_s9 = smov [#allocation12]  }
 0x31a   :  { %s618_s11 = sshll.u32 %s1035_s9, 4  ;;  %s619_s11 = int_to_ptr.vmem [resolvable:$true] %s618_s11 }
 0x31b   :  { %s993_s8 = scalar_lea.vmem %s619_s11, 128  ;;  %p998_p7 = scmp.lt.s32.totalorder %s619_s11, %s619_s11 }
 0x31c   :  { %p994_p6 = scmp.ne.s32.totalorder %s619_s11, %s993_s8  ;;  %p999_p8 = scmp.lt.s32.totalorder %s993_s8, %s993_s8 }
 0x31e   :  { %p1000_p9 = por %p999_p8, %p998_p7 }
 0x320   :  { %p1001_p10 = pnand %p1000_p9, %p994_p6 }
 0x3e3   :  { %v572_v1 = vpop.f32.mrb[4].mxu1 }
 0x3e4   :  { %v573_v2 = vadd.f32 %v666_v0, %v572_v1  ;;  %v807_v3 = vpop.f32.mrb[5].mxu1 }
 0x3e5   :  { %v575_v4 = vpop.f32.mrb[6].mxu1 }
 0x3e6   :  { %v675_v5 = vmul.f32 -1.442695, %v573_v2  ;;  %v576_v6 = vadd.f32 %v666_v0, %v575_v4  ;;  %v808_v7 = vpop.f32.mrb[7].mxu1 }
 0x3e8   :  { %853 = vpow2.f32 %v675_v5  ;;  %v676_v8 = vmul.f32 -1.442695, %v576_v6 }
 0x3ea   :  { %855 = vpow2.f32 %v676_v8 }
 0x3f2   :  { %v854_v9 = vpop.eup %853 }
 0x3f3   :  { %v585_v10 = vadd.f32 1.0, %v854_v9 }
 0x3f4   :  { %v856_v11 = vpop.eup %855 }
 0x3f5   :  { %v586_v12 = vadd.f32 1.0, %v856_v11  ;;  %857 = vrcp.f32 %v585_v10 }
 0x3f7   :  { %859 = vrcp.f32 %v586_v12 }
 0x3ff   :  { %v858_v13 = vpop.eup %857 }
 0x401   :  { %v860_v14 = vpop.eup %859 }
 0x402   :  { %v691_v15 = vpack.c.bf16 %v860_v14, %v858_v13 }
 0x404   :  { %692 = vst [vmem:[#allocation12] sm:$0xff] %v691_v15  }
 0x405   :  { %1004 = shalt.err (!%p1001_p10)
}
 0x406   :  { %s1005_s12 = scalar_lea.hbm %s1272_s10, 128 }
 0x407   :  { %p1006_p11 = scmp.ne.s32.totalorder %s1272_s10, %s1005_s12  ;;  %p1009_p12 = scmp.lt.u32.totalorder %s1005_s12, %s1272_s10 }
 0x409   :  { %p1011_p13 = pnand %p1009_p12, %p1006_p11 }
 0x40b   :  { %1014 = shalt.err (!%p1011_p13)
}
 0x40c   :  { %624 = dma.vmem_to_hbm [thread:$0]  %s619_s11, 128, %s1272_s10, [#allocation13], %s1027_s25, %s1027_s25, %s1028_s26  }
 0x40d   :  { %1021 = dma.done.wait [#allocation4], 128  }
 0x40e   :  { %1022 = vsyncadd [#allocation4], 4294967168 }
 0x40f   :  { %1023 = dma.done.wait [#allocation13], 128  }
 0x410   :  { %1024 = vsyncadd [#allocation13], 4294967168 }
 0x411   :  { %631 = vsyncpa [#allocation3], 1 }
 0x412   :  { %632 = vsyncpa [#allocation6], 1 }
 0x413   :  { %633 = vsyncpa [#allocation9], 1 }
 0x414   :  { %634 = vsyncpa [#allocation4], 1 }
 0x415   :  { %635 = vsyncpa [#allocation13], 1 }

// kernel: tpu_custom_call.1
= control target key start
LH: loop header
LB: loop body
LE: loop exit
PB: predicated region body
PF: predicated region fallthrough
CT: control target
= control target key end

     0   :  { %16 = vsyncpa [#allocation3], 0  ;;  %s1262_s0 = inlined_call_operand.hbm [shape: bf16[16,128], index: 0, kind: input, shape index: {}]   ;;  %s1263_s1 = inlined_call_operand.hbm [shape: bf16[128,128], index: 1, kind: input, shape index: {}]   ;;  %s1264_s2 = inlined_call_operand.vmem [shape: f32[1,128], index: 2, kind: input, shape index: {}]   ;;  %s1265_s3 = inlined_call_operand.hbm [shape: bf16[128,128], index: 3, kind: input, shape index: {}]   ;;  %s1266_s4 = inlined_call_operand.vmem [shape: f32[1,128], index: 4, kind: input, shape index: {}]   ;;  %s1267_s5 = inlined_call_operand.hbm [shape: bf16[128,128], index: 5, kind: input, shape index: {}]   ;;  %s1268_s6 = inlined_call_operand.vmem [shape: f32[1,128], index: 6, kind: input, shape index: {}]   ;;  %s1269_s7 = inlined_call_operand.hbm [shape: bf16[128,128], index: 7, kind: input, shape index: {}]   ;;  %s1270_s8 = inlined_call_operand.vmem [shape: f32[1,128], index: 8, kind: input, shape index: {}]   ;;  %s1271_s9 = inlined_call_operand.hbm [shape: bf16[16,128], index: 9, kind: output, shape index: {0}]   ;;  %s1272_s10 = inlined_call_operand.hbm [shape: bf16[16,128], index: 10, kind: output, shape index: {1}]  }
   0x1   :  { %17 = vsyncpa [#allocation6], 0 }
   0x2   :  { %18 = vsyncpa [#allocation9], 0 }
   0x3   :  { %19 = vsyncpa [#allocation4], 0 }
   0x4   :  { %20 = vsyncpa [#allocation13], 0  ;;  %s1025_s13 = smov [#allocation5]   ;;  %s1026_s15 = smov [#allocation8]  }
   0x5   :  { %s38_s14 = sshll.u32 %s1025_s13, 4  ;;  %s66_s16 = sshll.u32 %s1026_s15, 4  ;;  %s39_s14 = int_to_ptr.vmem [resolvable:$true] %s38_s14  ;;  %s1091_s16 = int_to_ptr.vmem [resolvable:$true] %s66_s16 }
   0x6   :  { %s861_s19 = scalar_lea.hbm %s1263_s1, 1024 }
   0x7   :  { %p862_p0 = scmp.ne.s32.totalorder %s1263_s1, %s861_s19  ;;  %p865_p1 = scmp.lt.u32.totalorder %s861_s19, %s1263_s1 }
   0x9   :  { %p867_p2 = pnand %p865_p1, %p862_p0 }
   0xb   :  { %870 = shalt.err (!%p867_p2)
}
   0xc   :  { %s871_s24 = scalar_lea.vmem %s39_s14, 1024  ;;  %p876_p4 = scmp.lt.s32.totalorder %s39_s14, %s39_s14 }
   0xd   :  { %p872_p3 = scmp.ne.s32.totalorder %s39_s14, %s871_s24  ;;  %p877_p5 = scmp.lt.s32.totalorder %s871_s24, %s871_s24 }
   0xf   :  { %p878_p6 = por %p877_p5, %p876_p4 }
  0x11   :  { %p879_p7 = pnand %p878_p6, %p872_p3 }
  0x13   :  { %882 = shalt.err (!%p879_p7)
}
  0x14   :  { %s1027_s25 = smov 64   ;;  %s1028_s26 = smov 4  }
  0x15   :  { %44 = dma.hbm_to_vmem [thread:$0]  %s1263_s1, 1024, %s39_s14, [#allocation6], %s1027_s25, %s1027_s25, %s1028_s26  }
  0x16   :  { %s883_s11 = scalar_lea.hbm %s1267_s5, 1024 }
  0x17   :  { %p884_p8 = scmp.ne.s32.totalorder %s1267_s5, %s883_s11  ;;  %p887_p9 = scmp.lt.u32.totalorder %s883_s11, %s1267_s5 }
  0x19   :  { %p889_p10 = pnand %p887_p9, %p884_p8 }
  0x1b   :  { %892 = shalt.err (!%p889_p10)
}
  0x1c   :  { %s893_s18 = scalar_lea.vmem %s1091_s16, 1024  ;;  %p898_p12 = scmp.lt.s32.totalorder %s1091_s16, %s1091_s16 }
  0x1d   :  { %p894_p11 = scmp.ne.s32.totalorder %s1091_s16, %s893_s18  ;;  %p899_p13 = scmp.lt.s32.totalorder %s893_s18, %s893_s18 }
  0x1f   :  { %p900_p0 = por %p899_p13, %p898_p12 }
  0x21   :  { %p901_p1 = pnand %p900_p0, %p894_p11 }
  0x23   :  { %904 = shalt.err (!%p901_p1)
}
  0x24   :  { %72 = dma.hbm_to_vmem [thread:$0]  %s1267_s5, 1024, %s1091_s16, [#allocation9], %s1027_s25, %s1027_s25, %s1028_s26  }
  0x25   :  { %s1029_s19 = smov [#allocation2]   ;;  %s1030_s21 = smov [#allocation7]  }
  0x26   :  { %s26_s20 = sshll.u32 %s1029_s19, 4  ;;  %s52_s22 = sshll.u32 %s1030_s21, 4  ;;  %s27_s20 = int_to_ptr.vmem [resolvable:$true] %s26_s20  ;;  %s1128_s22 = int_to_ptr.vmem [resolvable:$true] %s52_s22 }
  0x27   :  { %s905_s27 = scalar_lea.hbm %s1262_s0, 128 }
  0x28   :  { %p906_p2 = scmp.ne.s32.totalorder %s1262_s0, %s905_s27  ;;  %p909_p3 = scmp.lt.u32.totalorder %s905_s27, %s1262_s0 }
  0x2a   :  { %p911_p4 = pnand %p909_p3, %p906_p2 }
  0x2c   :  { %914 = shalt.err (!%p911_p4)
}
  0x2d   :  { %s915_s5 = scalar_lea.vmem %s27_s20, 128  ;;  %p920_p6 = scmp.lt.s32.totalorder %s27_s20, %s27_s20 }
  0x2e   :  { %p916_p5 = scmp.ne.s32.totalorder %s27_s20, %s915_s5  ;;  %p921_p7 = scmp.lt.s32.totalorder %s915_s5, %s915_s5 }
  0x30   :  { %p922_p8 = por %p921_p7, %p920_p6 }
  0x32   :  { %p923_p9 = pnand %p922_p8, %p916_p5 }
  0x34   :  { %926 = shalt.err (!%p923_p9)
}
  0x35   :  { %32 = dma.hbm_to_vmem [thread:$0]  %s1262_s0, 128, %s27_s20, [#allocation3], %s1027_s25, %s1027_s25, %s1028_s26  }
  0x36   :  { %s927_s17 = scalar_lea.hbm %s1265_s3, 1024 }
  0x37   :  { %p928_p10 = scmp.ne.s32.totalorder %s1265_s3, %s927_s17  ;;  %p931_p11 = scmp.lt.u32.totalorder %s927_s17, %s1265_s3 }
  0x39   :  { %p933_p12 = pnand %p931_p11, %p928_p10 }
  0x3b   :  { %936 = shalt.err (!%p933_p12)
}
  0x3c   :  { %s937_s21 = scalar_lea.vmem %s1128_s22, 1024  ;;  %p942_p0 = scmp.lt.s32.totalorder %s1128_s22, %s1128_s22 }
  0x3d   :  { %p938_p13 = scmp.ne.s32.totalorder %s1128_s22, %s937_s21  ;;  %p943_p1 = scmp.lt.s32.totalorder %s937_s21, %s937_s21 }
  0x3f   :  { %p944_p2 = por %p943_p1, %p942_p0 }
  0x41   :  { %p945_p3 = pnand %p944_p2, %p938_p13 }
  0x43   :  { %948 = shalt.err (!%p945_p3)
}
  0x44   :  { %58 = dma.hbm_to_vmem [thread:$0]  %s1265_s3, 1024, %s1128_s22, [#allocation6], %s1027_s25, %s1027_s25, %s1028_s26  }
  0x45   :  { %s1031_s23 = smov [#allocation10]   ;;  %s949_s29 = scalar_lea.hbm %s1269_s7, 1024 }
  0x46   :  { %s80_s24 = sshll.u32 %s1031_s23, 4  ;;  %p950_p4 = scmp.ne.s32.totalorder %s1269_s7, %s949_s29  ;;  %s81_s24 = int_to_ptr.vmem [resolvable:$true] %s80_s24 }
  0x47   :  { %p953_p5 = scmp.lt.u32.totalorder %s949_s29, %s1269_s7 }
  0x49   :  { %p955_p6 = pnand %p953_p5, %p950_p4 }
  0x4b   :  { %958 = shalt.err (!%p955_p6)
}
  0x4c   :  { %s959_s12 = scalar_lea.vmem %s81_s24, 1024  ;;  %p964_p8 = scmp.lt.s32.totalorder %s81_s24, %s81_s24 }
  0x4d   :  { %p960_p7 = scmp.ne.s32.totalorder %s81_s24, %s959_s12  ;;  %p965_p9 = scmp.lt.s32.totalorder %s959_s12, %s959_s12 }
  0x4f   :  { %p966_p10 = por %p965_p9, %p964_p8 }
  0x51   :  { %p967_p11 = pnand %p966_p10, %p960_p7 }
  0x53   :  { %970 = shalt.err (!%p967_p11)
}
  0x54   :  { %86 = dma.hbm_to_vmem [thread:$0]  %s1269_s7, 1024, %s81_s24, [#allocation9], %s1027_s25, %s1027_s25, %s1028_s26  }
  0x55   :  { %1015 = dma.done.wait [#allocation3], 128  }
  0x56   :  { %1016 = vsyncadd [#allocation3], 4294967168 }
  0x57   :  { %1017 = dma.done.wait [#allocation6], 2048  }
  0x58   :  { %1018 = vsyncadd [#allocation6], 4294965248 }
  0x59   :  { %1019 = dma.done.wait [#allocation9], 2048  }
  0x5a   :  { %1020 = vsyncadd [#allocation9], 4294965248  ;;  %v1032_v0 = vmov 0.0   ;;  %vm1033_vm0 = vmmov 0   ;;  %v820_v1 = vld [vmem:[#allocation5] sm:$0xff]   ;;  %v821_v2 = vld [vmem:[#allocation5 + $0x8] sm:$0xff]  }
  0x5b   :  { %729 = vmatprep.subr.bf16.mxu0 %v1032_v0  ;;  %745 = vmatprep.mubr.msk.bf16.mxu0 %vm1033_vm0, %v1032_v0  ;;  %v822_v3 = vld [vmem:[#allocation5 + $0x10] sm:$0xff]   ;;  %v829_v4 = vld [vmem:[#allocation7] sm:$0xff]   ;;  %v823_v5 = vld [vmem:[#allocation5 + $0x18] sm:$0xff]  }
  0x5c   :  { %749 = vmatprep.subr.bf16.mxu1 %v1032_v0  ;;  %765 = vmatprep.mubr.msk.bf16.mxu1 %vm1033_vm0, %v1032_v0  ;;  %v830_v6 = vld [vmem:[#allocation7 + $0x8] sm:$0xff]   ;;  %v824_v7 = vld [vmem:[#allocation5 + $0x20] sm:$0xff]   ;;  %v831_v8 = vld [vmem:[#allocation7 + $0x10] sm:$0xff]  }
  0x5d   :  { %730 = vmatpush3.bf16.msra.mxu0 %v820_v1  ;;  %750 = vmatpush3.bf16.msra.mxu1 %v829_v4  ;;  %v825_v9 = vld [vmem:[#allocation5 + $0x28] sm:$0xff]   ;;  %v832_v10 = vld [vmem:[#allocation7 + $0x18] sm:$0xff]   ;;  %v826_v11 = vld [vmem:[#allocation5 + $0x30] sm:$0xff]  }
  0x5e   :  { %731 = vmatprep.subr.bf16.mxu0 %v1032_v0  ;;  %751 = vmatprep.subr.bf16.mxu1 %v1032_v0  ;;  %v833_v12 = vld [vmem:[#allocation7 + $0x20] sm:$0xff]   ;;  %v827_v13 = vld [vmem:[#allocation5 + $0x38] sm:$0xff]   ;;  %v834_v14 = vld [vmem:[#allocation7 + $0x28] sm:$0xff]  }
  0x5f   :  { %v828_v15 = vld [vmem:[#allocation2] sm:$0xff]   ;;  %v835_v16 = vld [vmem:[#allocation7 + $0x30] sm:$0xff]   ;;  %v837_v18 = vld [vmem:[#allocation8] sm:$0xff]  }
  0x60   :  { %v836_v17 = vld [vmem:[#allocation7 + $0x38] sm:$0xff]   ;;  %v838_v19 = vld [vmem:[#allocation8 + $0x8] sm:$0xff]   ;;  %v839_v20 = vld [vmem:[#allocation8 + $0x10] sm:$0xff]  }
  0x61   :  { %732 = vmatpush3.bf16.msra.mxu0 %v821_v2  ;;  %752 = vmatpush3.bf16.msra.mxu1 %v830_v6  ;;  %v840_v21 = vld [vmem:[#allocation8 + $0x18] sm:$0xff]   ;;  %v841_v22 = vld [vmem:[#allocation8 + $0x20] sm:$0xff]   ;;  %v842_v23 = vld [vmem:[#allocation8 + $0x28] sm:$0xff]  }
  0x62   :  { %733 = vmatprep.subr.bf16.mxu0 %v1032_v0  ;;  %753 = vmatprep.subr.bf16.mxu1 %v1032_v0  ;;  %v636_v24 = vld [vmem:[%s1264_s2] ss:$0 sm:$0xff]  ;;  %v843_v34 = vld [vmem:[#allocation8 + $0x30] sm:$0xff]   ;;  %v845_v36 = vld [vmem:[#allocation10] sm:$0xff]  }
  0x63   :  { %v844_v35 = vld [vmem:[#allocation8 + $0x38] sm:$0xff]   ;;  %v846_v37 = vld [vmem:[#allocation10 + $0x8] sm:$0xff]   ;;  %v847_v38 = vld [vmem:[#allocation10 + $0x10] sm:$0xff]  }
  0x64   :  { %v848_v39 = vld [vmem:[#allocation10 + $0x18] sm:$0xff]   ;;  %v849_v40 = vld [vmem:[#allocation10 + $0x20] sm:$0xff]   ;;  %v850_v41 = vld [vmem:[#allocation10 + $0x28] sm:$0xff]  }
  0x65   :  { %734 = vmatpush3.bf16.msra.mxu0 %v822_v3  ;;  %754 = vmatpush3.bf16.msra.mxu1 %v831_v8  ;;  %v646_v42 = vld [vmem:[%s1266_s4] ss:$0 sm:$0xff]  ;;  %v851_v52 = vld [vmem:[#allocation10 + $0x30] sm:$0xff]   ;;  %s1034_s4 = smov [#allocation11]  }
  0x66   :  { %735 = vmatprep.subr.bf16.mxu0 %v1032_v0  ;;  %755 = vmatprep.subr.bf16.mxu1 %v1032_v0  ;;  %v852_v53 = vld [vmem:[#allocation10 + $0x38] sm:$0xff]   ;;  %s606_s1 = sshll.u32 %s1034_s4, 4  ;;  %s607_s1 = int_to_ptr.vmem [resolvable:$true] %s606_s1 }
  0x67   :  { %v657_v54 = vld [vmem:[%s1268_s6] ss:$0 sm:$0xff]  ;;  %s971_s14 = scalar_lea.vmem %s607_s1, 128  ;;  %p976_p13 = scmp.lt.s32.totalorder %s607_s1, %s607_s1 }
  0x68   :  { %p972_p12 = scmp.ne.s32.totalorder %s607_s1, %s971_s14  ;;  %p977_p0 = scmp.lt.s32.totalorder %s971_s14, %s971_s14 }
  0x69   :  { %736 = vmatpush3.bf16.msra.mxu0 %v823_v5  ;;  %756 = vmatpush3.bf16.msra.mxu1 %v832_v10 }
  0x6a   :  { %737 = vmatprep.subr.bf16.mxu0 %v1032_v0  ;;  %757 = vmatprep.subr.bf16.mxu1 %v1032_v0  ;;  %p978_p1 = por %p977_p0, %p976_p13 }
  0x6c   :  { %p979_p2 = pnand %p978_p1, %p972_p12 }
  0x6d   :  { %738 = vmatpush3.bf16.msra.mxu0 %v824_v7  ;;  %758 = vmatpush3.bf16.msra.mxu1 %v833_v12 }
  0x6e   :  { %739 = vmatprep.subr.bf16.mxu0 %v1032_v0  ;;  %759 = vmatprep.subr.bf16.mxu1 %v1032_v0 }
  0x71   :  { %740 = vmatpush3.bf16.msra.mxu0 %v825_v9  ;;  %760 = vmatpush3.bf16.msra.mxu1 %v834_v14 }
  0x72   :  { %741 = vmatprep.subr.bf16.mxu0 %v1032_v0  ;;  %761 = vmatprep.subr.bf16.mxu1 %v1032_v0 }
  0x75   :  { %742 = vmatpush3.bf16.msra.mxu0 %v826_v11  ;;  %762 = vmatpush3.bf16.msra.mxu1 %v835_v16 }
  0x76   :  { %743 = vmatprep.subr.bf16.mxu0 %v1032_v0  ;;  %763 = vmatprep.subr.bf16.mxu1 %v1032_v0 }
  0x79   :  { %744 = vmatpush3.bf16.msra.mxu0 %v827_v13  ;;  %764 = vmatpush3.bf16.msra.mxu1 %v836_v17 }
  0x7a   :  { %769 = vmatprep.subr.bf16.mxu0 %v1032_v0  ;;  %789 = vmatprep.subr.bf16.mxu1 %v1032_v0 }
  0x7c   :  { %746 = vmatmul.mubr.bf16.vlgmr.msra.gmra.mrb[0].mxu0 %v828_v15 }
  0x7d   :  { %785 = vmatprep.mubr.msk.bf16.mxu0 %vm1033_vm0, %v1032_v0  ;;  %770 = vmatpush3.bf16.msra.mxu0 %v837_v18 }
  0x7e   :  { %771 = vmatprep.subr.bf16.mxu0 %v1032_v0 }
  0x81   :  { %772 = vmatpush3.bf16.msra.mxu0 %v838_v19 }
  0x82   :  { %773 = vmatprep.subr.bf16.mxu0 %v1032_v0 }
  0x85   :  { %774 = vmatpush3.bf16.msra.mxu0 %v839_v20 }
  0x86   :  { %775 = vmatprep.subr.bf16.mxu0 %v1032_v0 }
  0x89   :  { %776 = vmatpush3.bf16.msra.mxu0 %v840_v21 }
  0x8a   :  { %777 = vmatprep.subr.bf16.mxu0 %v1032_v0 }
  0x8d   :  { %778 = vmatpush3.bf16.msra.mxu0 %v841_v22 }
  0x8e   :  { %779 = vmatprep.subr.bf16.mxu0 %v1032_v0 }
  0x91   :  { %780 = vmatpush3.bf16.msra.mxu0 %v842_v23 }
  0x92   :  { %781 = vmatprep.subr.bf16.mxu0 %v1032_v0 }
  0x95   :  { %782 = vmatpush3.bf16.msra.mxu0 %v843_v34 }
  0x96   :  { %783 = vmatprep.subr.bf16.mxu0 %v1032_v0 }
  0x99   :  { %784 = vmatpush3.bf16.msra.mxu0 %v844_v35 }
 0x14f   :  { %v218_v25 = vpop.f32.mrb[0].mxu0 }
 0x150   :  { %v219_v26 = vadd.f32 %v636_v24, %v218_v25  ;;  %v747_v27 = vpop.f32.mrb[1].mxu0 }
 0x151   :  { %v221_v28 = vpop.f32.mrb[2].mxu0 }
 0x152   :  { %v222_v29 = vadd.f32 %v636_v24, %v221_v28  ;;  %v748_v30 = vpop.f32.mrb[3].mxu0  ;;  %v225_v31 = vmax.f32 %v219_v26, 0.0 }
 0x154   :  { %v226_v32 = vmax.f32 %v222_v29, 0.0 }
 0x156   :  { %v227_v33 = vpack.c.bf16 %v226_v32, %v225_v31 }
 0x158   :  { %766 = vmatmul.mubr.bf16.vlgmr.msra.gmra.mrb[0].mxu1 %v227_v33 }
 0x159   :  { %805 = vmatprep.mubr.msk.bf16.mxu1 %vm1033_vm0, %v1032_v0  ;;  %790 = vmatpush3.bf16.msra.mxu1 %v845_v36 }
 0x15a   :  { %791 = vmatprep.subr.bf16.mxu1 %v1032_v0 }
 0x15d   :  { %792 = vmatpush3.bf16.msra.mxu1 %v846_v37 }
 0x15e   :  { %793 = vmatprep.subr.bf16.mxu1 %v1032_v0 }
 0x161   :  { %794 = vmatpush3.bf16.msra.mxu1 %v847_v38 }
 0x162   :  { %795 = vmatprep.subr.bf16.mxu1 %v1032_v0 }
 0x165   :  { %796 = vmatpush3.bf16.msra.mxu1 %v848_v39 }
 0x166   :  { %797 = vmatprep.subr.bf16.mxu1 %v1032_v0 }
 0x169   :  { %798 = vmatpush3.bf16.msra.mxu1 %v849_v40 }
 0x16a   :  { %799 = vmatprep.subr.bf16.mxu1 %v1032_v0 }
 0x16d   :  { %800 = vmatpush3.bf16.msra.mxu1 %v850_v41 }
 0x16e   :  { %801 = vmatprep.subr.bf16.mxu1 %v1032_v0 }
 0x171   :  { %802 = vmatpush3.bf16.msra.mxu1 %v851_v52 }
 0x172   :  { %803 = vmatprep.subr.bf16.mxu1 %v1032_v0 }
 0x175   :  { %804 = vmatpush3.bf16.msra.mxu1 %v852_v53 }
 0x22b   :  { %v333_v43 = vpop.f32.mrb[0].mxu1 }
 0x22c   :  { %v334_v44 = vadd.f32 %v646_v42, %v333_v43  ;;  %v767_v45 = vpop.f32.mrb[1].mxu1 }
 0x22d   :  { %v336_v46 = vpop.f32.mrb[2].mxu1 }
 0x22e   :  { %v337_v47 = vadd.f32 %v646_v42, %v336_v46  ;;  %v768_v48 = vpop.f32.mrb[3].mxu1  ;;  %v340_v49 = vmax.f32 %v334_v44, 0.0 }
 0x230   :  { %v341_v50 = vmax.f32 %v337_v47, 0.0 }
 0x232   :  { %v342_v51 = vpack.c.bf16 %v341_v50, %v340_v49 }
 0x234   :  { %687 = vst [vmem:[#allocation11] sm:$0xff] %v342_v51   ;;  %786 = vmatmul.mubr.bf16.vlgmr.msra.gmra.mrb[4].mxu0 %v342_v51 }
 0x307   :  { %v457_v55 = vpop.f32.mrb[4].mxu0 }
 0x308   :  { %v458_v56 = vadd.f32 %v657_v54, %v457_v55  ;;  %v787_v57 = vpop.f32.mrb[5].mxu0 }
 0x309   :  { %v460_v58 = vpop.f32.mrb[6].mxu0 }
 0x30a   :  { %v461_v59 = vadd.f32 %v657_v54, %v460_v58  ;;  %v788_v60 = vpop.f32.mrb[7].mxu0  ;;  %v464_v61 = vmax.f32 %v458_v56, 0.0 }
 0x30c   :  { %v465_v62 = vmax.f32 %v461_v59, 0.0 }
 0x30e   :  { %v466_v63 = vpack.c.bf16 %v465_v62, %v464_v61 }
 0x310   :  { %806 = vmatmul.mubr.bf16.vlgmr.msra.gmra.mrb[4].mxu1 %v466_v63 }
 0x311   :  { %982 = shalt.err (!%p979_p2)
}
 0x312   :  { %s983_s21 = scalar_lea.hbm %s1271_s9, 128 }
 0x313   :  { %p984_p3 = scmp.ne.s32.totalorder %s1271_s9, %s983_s21  ;;  %p987_p4 = scmp.lt.u32.totalorder %s983_s21, %s1271_s9 }
 0x315   :  { %p989_p5 = pnand %p987_p4, %p984_p3 }
 0x317   :  { %992 = shalt.err (!%p989_p5)
}
 0x318   :  { %612 = dma.vmem_to_hbm [thread:$0]  %s607_s1, 128, %s1271_s9, [#allocation4], %s1027_s25, %s1027_s25, %s1028_s26  }
 0x319   :  { %v666_v0 = vld [vmem:[%s1270_s8] ss:$0 sm:$0xff]  ;;  %s1035_s9 = smov [#allocation12]  }
 0x31a   :  { %s618_s11 = sshll.u32 %s1035_s9, 4  ;;  %s619_s11 = int_to_ptr.vmem [resolvable:$true] %s618_s11 }
 0x31b   :  { %s993_s8 = scalar_lea.vmem %s619_s11, 128  ;;  %p998_p7 = scmp.lt.s32.totalorder %s619_s11, %s619_s11 }
 0x31c   :  { %p994_p6 = scmp.ne.s32.totalorder %s619_s11, %s993_s8  ;;  %p999_p8 = scmp.lt.s32.totalorder %s993_s8, %s993_s8 }
 0x31e   :  { %p1000_p9 = por %p999_p8, %p998_p7 }
 0x320   :  { %p1001_p10 = pnand %p1000_p9, %p994_p6 }
 0x3e3   :  { %v572_v1 = vpop.f32.mrb[4].mxu1 }
 0x3e4   :  { %v573_v2 = vadd.f32 %v666_v0, %v572_v1  ;;  %v807_v3 = vpop.f32.mrb[5].mxu1 }
 0x3e5   :  { %v575_v4 = vpop.f32.mrb[6].mxu1 }
 0x3e6   :  { %v675_v5 = vmul.f32 -1.442695, %v573_v2  ;;  %v576_v6 = vadd.f32 %v666_v0, %v575_v4  ;;  %v808_v7 = vpop.f32.mrb[7].mxu1 }
 0x3e8   :  { %853 = vpow2.f32 %v675_v5  ;;  %v676_v8 = vmul.f32 -1.442695, %v576_v6 }
 0x3ea   :  { %855 = vpow2.f32 %v676_v8 }
 0x3f2   :  { %v854_v9 = vpop.eup %853 }
 0x3f3   :  { %v585_v10 = vadd.f32 1.0, %v854_v9 }
 0x3f4   :  { %v856_v11 = vpop.eup %855 }
 0x3f5   :  { %v586_v12 = vadd.f32 1.0, %v856_v11  ;;  %857 = vrcp.f32 %v585_v10 }
 0x3f7   :  { %859 = vrcp.f32 %v586_v12 }
 0x3ff   :  { %v858_v13 = vpop.eup %857 }
 0x401   :  { %v860_v14 = vpop.eup %859 }
 0x402   :  { %v691_v15 = vpack.c.bf16 %v860_v14, %v858_v13 }
 0x404   :  { %692 = vst [vmem:[#allocation12] sm:$0xff] %v691_v15  }
 0x405   :  { %1004 = shalt.err (!%p1001_p10)
}
 0x406   :  { %s1005_s12 = scalar_lea.hbm %s1272_s10, 128 }
 0x407   :  { %p1006_p11 = scmp.ne.s32.totalorder %s1272_s10, %s1005_s12  ;;  %p1009_p12 = scmp.lt.u32.totalorder %s1005_s12, %s1272_s10 }
 0x409   :  { %p1011_p13 = pnand %p1009_p12, %p1006_p11 }
 0x40b   :  { %1014 = shalt.err (!%p1011_p13)
}
 0x40c   :  { %624 = dma.vmem_to_hbm [thread:$0]  %s619_s11, 128, %s1272_s10, [#allocation13], %s1027_s25, %s1027_s25, %s1028_s26  }
 0x40d   :  { %1021 = dma.done.wait [#allocation4], 128  }
 0x40e   :  { %1022 = vsyncadd [#allocation4], 4294967168 }
 0x40f   :  { %1023 = dma.done.wait [#allocation13], 128  }
 0x410   :  { %1024 = vsyncadd [#allocation13], 4294967168 }
 0x411   :  { %631 = vsyncpa [#allocation3], 1 }
 0x412   :  { %632 = vsyncpa [#allocation6], 1 }
 0x413   :  { %633 = vsyncpa [#allocation9], 1 }
 0x414   :  { %634 = vsyncpa [#allocation4], 1 }
 0x415   :  { %635 = vsyncpa [#allocation13], 1 }

</bundles_post_ra>
